<compile_context>
chip_gen: v7x
topology: tpu7x:2x2x1
jax: 0.10.0
libtpu: 0.0.40
codegen_flags: <defaults>
</compile_context>

<pallas_src>
import jax
import jax.numpy as jnp
from jax.experimental import pallas as pl
from jax.experimental.pallas import tpu as pltpu


# ----------------------------------------------------------------------------
# Small helpers
# ----------------------------------------------------------------------------

def _cdiv(a, b):
    return (a + b - 1) // b


def _round_up(x, m):
    return _cdiv(x, m) * m


def _vmem_limit_bytes():
    """Generation-aware VMEM limit: ~75% of physical capacity.

    ~96 MiB on v5e/v6e (128 MiB physical), ~48 MiB on v7x (64 MiB physical).
    """
    cap = 128 * 1024 * 1024
    try:
        info = pltpu.get_tpu_info()
        cap = int(getattr(info, "vmem_capacity_bytes", cap))
    except Exception:
        pass
    return max(32 * 1024 * 1024, (cap * 3) // 4)


# ----------------------------------------------------------------------------
# Kernels
# ----------------------------------------------------------------------------

def _bmm_tiled_kernel_acc(a_ref, b_ref, o_ref, acc_ref):
    """K-reduction with an explicit f32 accumulator (non-f32 output dtype)."""
    # Batch dim is squeezed out by the BlockSpecs:
    #   a_ref: (tm, tk), b_ref: (tk, tn), o_ref: (tm, tn), acc_ref: (tm, tn)
    @pl.when(pl.program_id(3) == 0)
    def _():
        acc_ref[...] = jnp.zeros_like(acc_ref)

    acc_ref[...] += jnp.dot(a_ref[...], b_ref[...],
                            preferred_element_type=jnp.float32)

    @pl.when(pl.program_id(3) == pl.num_programs(3) - 1)
    def _():
        o_ref[...] = acc_ref[...].astype(o_ref.dtype)


def _bmm_tiled_kernel_f32(a_ref, b_ref, o_ref):
    """f32 output: accumulate directly into the VMEM-resident output block.

    The output block index ignores k, so o_ref stays resident across the whole
    K sweep -- no scratch accumulator, no final copy pass, one fewer tm x tn
    VMEM read/write sweep per K step (relieves the vst slot, esp. on v5e).
    """
    @pl.when(pl.program_id(3) == 0)
    def _():
        o_ref[...] = jnp.zeros_like(o_ref)

    o_ref[...] += jnp.dot(a_ref[...], b_ref[...],
                          preferred_element_type=jnp.float32)


def _bmm_batched_kernel(a_ref, b_ref, o_ref):
    # a_ref: (bt, M, K), b_ref: (bt, K, N), o_ref: (bt, M, N)
    o_ref[...] = jnp.einsum(
        "bmk,bkn->bmn", a_ref[...], b_ref[...],
        preferred_element_type=jnp.float32,
    ).astype(o_ref.dtype)


# ----------------------------------------------------------------------------
# Tiled path
# ----------------------------------------------------------------------------

def _select_tiles(M, N, K, a_dtype, b_dtype, tm_pref, tn_pref, tk_pref):
    """Pick (tm, tn, tk, K_padded, sub_align) with dtype-aware alignment."""
    itemsize = min(jnp.dtype(a_dtype).itemsize, jnp.dtype(b_dtype).itemsize)
    # Sublane packing: 8 rows/vreg for 4-byte, 16 for 2-byte, 32 for 1-byte.
    sub_align = {4: 8, 2: 16, 1: 32}.get(itemsize, 8)
    if itemsize <= 2:
        # bf16/int8: a deeper K panel costs the same VMEM as f32 at 512.
        tk_pref = max(tk_pref, 1024)
    tm_pref = _round_up(tm_pref, sub_align)
    tn_pref = _round_up(tn_pref, 128)

    # M/N tiles: either the preferred (aligned) size or the full dim, with a
    # cdiv grid + padded edge blocks handling the remainder.
    tm = M if M <= tm_pref else tm_pref
    tn = N if N <= tn_pref else tn_pref

    # K must be covered exactly (padded-K garbage would corrupt the
    # reduction): use the full dim, an aligned divisor, or explicit zero-pad.
    if K <= tk_pref:
        tk, k_pad = K, K
    else:
        tk = 0
        t = (tk_pref // 128) * 128
        while t >= 128:
            if K % t == 0:
                tk = t
                break
            t -= 128
        if tk == 0:
            tk = tk_pref
            k_pad = _round_up(K, tk)   # zero-pad in the wrapper
        else:
            k_pad = K
    return tm, tn, tk, k_pad, sub_align


def _bmm_tiled(a, b, out_dtype, cost, tm_pref, tn_pref, tk_pref):
    B, M, K = a.shape
    _, _, N = b.shape

    tm, tn, tk, k_pad, sub_align = _select_tiles(
        M, N, K, a.dtype, b.dtype, tm_pref, tn_pref, tk_pref)

    if k_pad != K:
        # Explicit zero-padding along K: padded zeros contribute nothing to
        # the reduction, so correctness is preserved.
        a = jnp.pad(a, ((0, 0), (0, 0), (0, k_pad - K)))
        b = jnp.pad(b, ((0, 0), (0, k_pad - K), (0, 0)))
        K = k_pad

    # v7x has 2 TensorCores sharded over the "parallel" axes: if the parallel
    # grid extent collapsed to a single step, split N (or M) so both cores
    # get work instead of leaving one idle.
    if B * _cdiv(M, tm) * _cdiv(N, tn) < 2:
        if N >= 2 * 128:
            tn = _round_up(_cdiv(N, 2), 128)
        elif M >= 2 * sub_align:
            tm = _round_up(_cdiv(M, 2), sub_align)

    grid = (B, _cdiv(M, tm), _cdiv(N, tn), K // tk)

    f32_out = jnp.dtype(out_dtype) == jnp.dtype(jnp.float32)
    kernel = _bmm_tiled_kernel_f32 if f32_out else _bmm_tiled_kernel_acc
    scratch = [] if f32_out else [pltpu.VMEM((tm, tn), jnp.float32)]

    return pl.pallas_call(
        kernel,
        out_shape=jax.ShapeDtypeStruct((B, M, N), out_dtype),
        grid_spec=pltpu.PrefetchScalarGridSpec(
            num_scalar_prefetch=0,
            grid=grid,
            in_specs=[
                # Leading `None` squeezes the batch dim -> kernel sees clean
                # 2-D (tm,tk)/(tk,tn) tiles.  The streamed A/B operands get
                # 3-deep pipelining to hide exposed HBM DMA latency.
                pl.BlockSpec((None, tm, tk), lambda bi, i, j, k: (bi, i, k),
                             pipeline_mode=pl.Buffered(3)),
                pl.BlockSpec((None, tk, tn), lambda bi, i, j, k: (bi, k, j),
                             pipeline_mode=pl.Buffered(3)),
            ],
            out_specs=pl.BlockSpec((None, tm, tn),
                                   lambda bi, i, j, k: (bi, i, j)),
            scratch_shapes=scratch,
        ),
        compiler_params=pltpu.CompilerParams(
            # K carries the accumulator -> "arbitrary"; B/M/N independent ->
            # "parallel" (megacore sharding on v7x).
            dimension_semantics=("parallel", "parallel", "parallel",
                                 "arbitrary"),
            vmem_limit_bytes=_vmem_limit_bytes(),
        ),
        cost_estimate=cost,
    )(a, b)


# ----------------------------------------------------------------------------
# Small-batch path
# ----------------------------------------------------------------------------

def _bmm_small(a, b, out_dtype, cost, per_batch_bytes):
    B, M, K = a.shape
    _, _, N = b.shape

    # Pack many tiny matmuls per grid step to amortize the ~600-cycle
    # per-step overhead: ~8 MiB operand budget per step (Pallas
    # double-buffers), capped so the batched dot does not blow up compile
    # time.  cdiv grid + padded edge block handles prime / indivisible B.
    budget = 8 * 1024 * 1024
    bt = max(1, min(B, 256, budget // max(per_batch_bytes, 1)))
    grid = (_cdiv(B, bt),)

    # TODO(synk): store a lane-dense (bt*M*N)-wide output slab instead of
    # (bt, M, N) with N < 128 (masked vst.msk); needs a general in-kernel
    # relayout/reshape.  Likewise, for M,N << 128 a lane-packed / VPU
    # broadcast-multiply formulation would avoid underfilling the 256x256 MXU
    # on v6e/v7x.
    return pl.pallas_call(
        _bmm_batched_kernel,
        out_shape=jax.ShapeDtypeStruct((B, M, N), out_dtype),
        grid_spec=pltpu.PrefetchScalarGridSpec(
            num_scalar_prefetch=0,
            grid=grid,
            in_specs=[
                pl.BlockSpec((bt, M, K), lambda i: (i, 0, 0)),
                pl.BlockSpec((bt, K, N), lambda i: (i, 0, 0)),
            ],
            out_specs=pl.BlockSpec((bt, M, N), lambda i: (i, 0, 0)),
        ),
        compiler_params=pltpu.CompilerParams(
            dimension_semantics=("parallel",),
            vmem_limit_bytes=_vmem_limit_bytes(),
        ),
        cost_estimate=cost,
    )(a, b)


# ----------------------------------------------------------------------------
# Public wrapper (== torch.bmm forward)
# ----------------------------------------------------------------------------

def bmm(a: jax.Array, b: jax.Array, *,
        tm_pref: int = 512, tn_pref: int = 512, tk_pref: int = 512) -> jax.Array:
    """Batched matmul equivalent to torch.bmm(a, b).

    a: [B, M, K], b: [B, K, N] -> [B, M, N]
    """
    B, M, K = a.shape
    B2, K2, N = b.shape
    assert B == B2 and K == K2, "shape mismatch for bmm"

    # Keep the input dtype for the output (bf16 in -> bf16 out); accumulation
    # is always f32 via preferred_element_type inside the kernels.
    out_dtype = jnp.promote_types(a.dtype, b.dtype)

    a_bytes = jnp.dtype(a.dtype).itemsize
    b_bytes = jnp.dtype(b.dtype).itemsize
    o_bytes = jnp.dtype(out_dtype).itemsize

    bytes_accessed = (a_bytes * B * M * K + b_bytes * B * K * N
                      + o_bytes * B * M * N)
    cost = pl.CostEstimate(flops=2 * B * M * N * K,
                           transcendentals=0,
                           bytes_accessed=bytes_accessed)

    per_batch_bytes = a_bytes * M * K + b_bytes * K * N + o_bytes * M * N
    if (M < 128 or N < 128 or K < 128) and per_batch_bytes <= (1 << 20):
        # Tiny per-batch matmuls: batch them per grid step instead of tiling.
        return _bmm_small(a, b, out_dtype, cost, per_batch_bytes)
    return _bmm_tiled(a, b, out_dtype, cost, tm_pref, tn_pref, tk_pref)


# ----------------------------------------------------------------------------
# Demo / correctness check
# ----------------------------------------------------------------------------

if __name__ == "__main__":
    key = jax.random.PRNGKey(0)
    k1, k2, k3, k4, k5, k6, k7, k8 = jax.random.split(key, 8)

    # Case 1: small per-batch matmuls (batched-per-step path).
    B, M, K, N = 2, 8, 32, 16
    a_s = jax.random.normal(k1, (B, M, K), dtype=jnp.float32)
    b_s = jax.random.normal(k2, (B, K, N), dtype=jnp.float32)
    out_s = jax.block_until_ready(bmm(a_s, b_s))
    ref_s = jnp.einsum("bmk,bkn->bmn", a_s, b_s)
    assert out_s.shape == (B, M, N)
    assert jnp.allclose(out_s, ref_s, atol=1e-4, rtol=1e-4)

    # Case 2: tiled f32 path, multi-step K reduction (direct o_ref accumulate).
    B2, M2, K2, N2 = 2, 128, 1024, 256
    a_t = jax.random.normal(k3, (B2, M2, K2), dtype=jnp.float32)
    b_t = jax.random.normal(k4, (B2, K2, N2), dtype=jnp.float32)
    out_t = jax.block_until_ready(bmm(a_t, b_t))
    ref_t = jnp.einsum("bmk,bkn->bmn", a_t, b_t)
    assert out_t.shape == (B2, M2, N2)
    assert jnp.allclose(out_t, ref_t, atol=1e-3, rtol=1e-3)

    # Case 3: bf16 inputs -> tiled path with f32 scratch accumulator.
    B3, M3, K3, N3 = 2, 128, 256, 256
    a_h = jax.random.normal(k5, (B3, M3, K3), dtype=jnp.bfloat16)
    b_h = jax.random.normal(k6, (B3, K3, N3), dtype=jnp.bfloat16)
    out_h = jax.block_until_ready(bmm(a_h, b_h))
    ref_h = jnp.einsum("bmk,bkn->bmn",
                       a_h.astype(jnp.float32), b_h.astype(jnp.float32))
    assert out_h.shape == (B3, M3, N3) and out_h.dtype == jnp.bfloat16
    assert jnp.allclose(out_h.astype(jnp.float32), ref_h, atol=0.5, rtol=0.05)

    # Case 4: indivisible M/N (cdiv grid, padded edge blocks) + two-core split.
    B4, M4, K4, N4 = 1, 200, 512, 384
    a_e = jax.random.normal(k7, (B4, M4, K4), dtype=jnp.float32)
    b_e = jax.random.normal(k8, (B4, K4, N4), dtype=jnp.float32)
    out_e = jax.block_until_ready(bmm(a_e, b_e))
    ref_e = jnp.einsum("bmk,bkn->bmn", a_e, b_e)
    assert out_e.shape == (B4, M4, N4)
    assert jnp.allclose(out_e, ref_e, atol=1e-3, rtol=1e-3)

    print("KERNEL_OK")
</pallas_src>

<mosaic_0001>
module attributes {stable_mosaic.version = 11 : i64} {
  func.func @_bmm_batched_kernel(%arg0: i32, %arg1: memref<2x8x32xf32, #tpu.memory_space<vmem>>, %arg2: memref<2x32x16xf32, #tpu.memory_space<vmem>>, %arg3: memref<2x8x16xf32, #tpu.memory_space<vmem>>) attributes {dimension_semantics = [#tpu.dimension_semantics<parallel>], iteration_bounds = array<i64: 1>, scalar_prefetch = 0 : i64, scratch_operands = 0 : i64, tpu.core_type = #tpu.core_type<tc>, window_params = [{transform_indices = @transform_0, window_bounds = array<i64: 2, 8, 32>}, {transform_indices = @transform_1, window_bounds = array<i64: 2, 32, 16>}, {transform_indices = @transform_2, window_bounds = array<i64: 2, 8, 16>}]} {
    %c0 = arith.constant 0 : index
    %c0_0 = arith.constant 0 : index
    %c0_1 = arith.constant 0 : index
    %0 = vector.load %arg1[%c0, %c0_0, %c0_1] : memref<2x8x32xf32, #tpu.memory_space<vmem>>, vector<2x8x32xf32>
    %c0_2 = arith.constant 0 : index
    %c0_3 = arith.constant 0 : index
    %c0_4 = arith.constant 0 : index
    %1 = vector.load %arg2[%c0_2, %c0_3, %c0_4] : memref<2x32x16xf32, #tpu.memory_space<vmem>>, vector<2x32x16xf32>
    "tpu.trace_start"() <{level = 10 : i32, message = "bmk,bkn->bmn"}> : () -> ()
    %cst = arith.constant dense<0.000000e+00> : vector<2x8x16xf32>
    %2 = tpu.matmul %0, %1, %cst {dimension_numbers = #tpu.dot_dimension_numbers<[2], [1], [1], [2], [0, 0, 0, 1, 1, 2], [0], [0]>} : vector<2x8x32xf32>, vector<2x32x16xf32>, vector<2x8x16xf32> -> vector<2x8x16xf32>
    "tpu.trace_stop"() : () -> ()
    %c0_5 = arith.constant 0 : index
    %c0_6 = arith.constant 0 : index
    %c0_7 = arith.constant 0 : index
    %3 = vector.load %arg3[%c0_5, %c0_6, %c0_7] : memref<2x8x16xf32, #tpu.memory_space<vmem>>, vector<2x8x16xf32>
    tpu.vector_store %arg3[%c0_5, %c0_6, %c0_7], %2 {strides = array<i32>} : memref<2x8x16xf32, #tpu.memory_space<vmem>>, vector<2x8x16xf32>,
    return
  }
  func.func @transform_0(%arg0: i32) -> (i32, i32, i32) {
    %c0_i32 = arith.constant 0 : i32
    %c0_i32_0 = arith.constant 0 : i32
    %c0_i32_1 = arith.constant 0 : i32
    return %arg0, %c0_i32, %c0_i32_0 : i32, i32, i32
  }
  func.func @transform_1(%arg0: i32) -> (i32, i32, i32) {
    %c0_i32 = arith.constant 0 : i32
    %c0_i32_0 = arith.constant 0 : i32
    %c0_i32_1 = arith.constant 0 : i32
    return %arg0, %c0_i32, %c0_i32_0 : i32, i32, i32
  }
  func.func @transform_2(%arg0: i32) -> (i32, i32, i32) {
    %c0_i32 = arith.constant 0 : i32
    %c0_i32_0 = arith.constant 0 : i32
    %c0_i32_1 = arith.constant 0 : i32
    return %arg0, %c0_i32, %c0_i32_0 : i32, i32, i32
  }
}

</mosaic_0001>

<bundles_post_ra>
// kernel: tpu_custom_call.1
= control target key start
LH: loop header
LB: loop body
LE: loop exit
PB: predicated region body
PF: predicated region fallthrough
CT: control target
= control target key end

     0   :  { %7 = vsyncpa [#allocation3], 0  ;;  %s412_s0 = inlined_call_operand.hbm [shape: f32[2,8,32], index: 0, kind: input, shape index: {}]   ;;  %s413_s1 = inlined_call_operand.hbm [shape: f32[2,32,16], index: 1, kind: input, shape index: {}]   ;;  %s414_s2 = inlined_call_operand.hbm [shape: f32[2,8,16], index: 2, kind: output, shape index: {}]  }
   0x1   :  { %8 = vsyncpa [#allocation6], 0 }
   0x2   :  { %9 = vsyncpa [#allocation4], 0  ;;  %s344_s9 = smov [#allocation2]   ;;  %s272_s13 = scalar_lea.hbm %s412_s0, 256 }
   0x3   :  { %s15_s10 = sshll.u32 %s344_s9, 4  ;;  %p273_p0 = scmp.ne.s32.totalorder %s412_s0, %s272_s13  ;;  %s16_s10 = int_to_ptr.vmem [resolvable:$true] %s15_s10 }
   0x4   :  { %p276_p1 = scmp.lt.u32.totalorder %s272_s13, %s412_s0 }
   0x6   :  { %p278_p2 = pnand %p276_p1, %p273_p0 }
   0x8   :  { %281 = shalt.err (!%p278_p2)
}
   0x9   :  { %s282_s18 = scalar_lea.vmem %s16_s10, 256  ;;  %p287_p4 = scmp.lt.s32.totalorder %s16_s10, %s16_s10 }
   0xa   :  { %p283_p3 = scmp.ne.s32.totalorder %s16_s10, %s282_s18  ;;  %p288_p5 = scmp.lt.s32.totalorder %s282_s18, %s282_s18 }
   0xc   :  { %p289_p6 = por %p288_p5, %p287_p4 }
   0xe   :  { %p290_p7 = pnand %p289_p6, %p283_p3 }
  0x10   :  { %293 = shalt.err (!%p290_p7)
}
  0x11   :  { %s345_s19 = smov 128   ;;  %s346_s20 = smov 8  }
  0x12   :  { %21 = dma.hbm_to_vmem [thread:$0]  %s412_s0, 256, %s16_s10, [#allocation3], %s345_s19, %s345_s19, %s346_s20  }
  0x13   :  { %s347_s23 = smov [#allocation5]   ;;  %s294_s27 = scalar_lea.hbm %s413_s1, 1024 }
  0x14   :  { %s27_s24 = sshll.u32 %s347_s23, 4  ;;  %p295_p8 = scmp.ne.s32.totalorder %s413_s1, %s294_s27  ;;  %s28_s24 = int_to_ptr.vmem [resolvable:$true] %s27_s24 }
  0x15   :  { %p298_p9 = scmp.lt.u32.totalorder %s294_s27, %s413_s1 }
  0x17   :  { %p300_p10 = pnand %p298_p9, %p295_p8 }
  0x19   :  { %303 = shalt.err (!%p300_p10)
}
  0x1a   :  { %s304_s4 = scalar_lea.vmem %s28_s24, 1024  ;;  %p309_p12 = scmp.lt.s32.totalorder %s28_s24, %s28_s24 }
  0x1b   :  { %p305_p11 = scmp.ne.s32.totalorder %s28_s24, %s304_s4  ;;  %p310_p13 = scmp.lt.s32.totalorder %s304_s4, %s304_s4 }
  0x1d   :  { %p311_p0 = por %p310_p13, %p309_p12 }
  0x1f   :  { %p312_p1 = pnand %p311_p0, %p305_p11 }
  0x21   :  { %315 = shalt.err (!%p312_p1)
}
  0x22   :  { %33 = dma.hbm_to_vmem [thread:$0]  %s413_s1, 1024, %s28_s24, [#allocation6], %s345_s19, %s345_s19, %s346_s20  }
  0x23   :  { %338 = dma.done.wait [#allocation3], 256  }
  0x24   :  { %339 = vsyncadd [#allocation3], 4294967040 }
  0x25   :  { %340 = dma.done.wait [#allocation6], 1024  }
  0x26   :  { %341 = vsyncadd [#allocation6], 4294966272  ;;  %v348_v0 = vmov 0.0|0.0   ;;  %vm349_vm0 = vmmov 0   ;;  %v350_v1 = vmov 0.0   ;;  %v42_v2 = vld [vmem:[#allocation5] sm:$0xff] }
  0x27   :  { %252 = vmatprep.subr.bf16.mxu0 %v348_v0  ;;  %258 = vmatprep.subr.bf16.mxu1 %v348_v0  ;;  %v43_v3 = vld [vmem:[#allocation5 + $0x8] sm:$0xff]  ;;  %v46_v4 = vld [vmem:[#allocation5 + $0x20] sm:$0xff]  ;;  %v44_v7 = vld [vmem:[#allocation5 + $0x10] sm:$0xff]  ;;  %vm50_vm1 = vcmask 261120   ;;  %s351_s1 = smov [#allocation7]   ;;  %vm197_vm2 = vcmask 130048  }
  0x28   :  { %238 = vmatprep.mubr.msk.f32.mxu0 %vm349_vm0, %v350_v1  ;;  %249 = vmatprep.mubr.msk.f32.mxu1 %vm349_vm0, %v350_v1  ;;  %v253_v5 = vpack.c.bf16 %v43_v3, %v42_v2  ;;  %v47_v6 = vld [vmem:[#allocation5 + $0x28] sm:$0xff]  ;;  %v45_v8 = vld [vmem:[#allocation5 + $0x18] sm:$0xff]  ;;  %v48_v10 = vld [vmem:[#allocation5 + $0x30] sm:$0xff]  ;;  %s205_s6 = sshll.u32 %s351_s1, 4  ;;  %s206_s6 = int_to_ptr.vmem [resolvable:$true] %s205_s6 }
  0x29   :  { %v259_v9 = vpack.c.bf16 %v47_v6, %v46_v4  ;;  %v49_v11 = vld [vmem:[#allocation5 + $0x38] sm:$0xff]  ;;  %v256_v12 = vpack.c.bf16 %v45_v8, %v44_v7  ;;  %v40_v14 = vld [vmem:[#allocation2] sm:$0xff]  ;;  %s316_s7 = scalar_lea.vmem %s206_s6, 256  ;;  %p321_p3 = scmp.lt.s32.totalorder %s206_s6, %s206_s6 }
  0x2a   :  { %254 = vmatpush3.bf16.msra.mxu0 %v253_v5  ;;  %v262_v13 = vpack.c.bf16 %v49_v11, %v48_v10  ;;  %v41_v15 = vld [vmem:[#allocation2 + $0x8] sm:$0xff]  ;;  %p317_p2 = scmp.ne.s32.totalorder %s206_s6, %s316_s7  ;;  %p322_p4 = scmp.lt.s32.totalorder %s316_s7, %s316_s7 }
  0x2b   :  { %260 = vmatpush3.bf16.msra.mxu1 %v259_v9  ;;  %255 = vmatprep.subr.bf16.mxu0 %v348_v0 }
  0x2c   :  { %261 = vmatprep.subr.bf16.mxu1 %v348_v0  ;;  %p323_p5 = por %p322_p4, %p321_p3 }
  0x2e   :  { %257 = vmatpush3.bf16.msra.mxu0 %v256_v12  ;;  %p324_p6 = pnand %p323_p5, %p317_p2 }
  0x2f   :  { %263 = vmatpush3.bf16.msra.mxu1 %v262_v13 }
  0x31   :  { %239 = vmatmul.mubr.msk.f32.vlgmr.msra.gmra.mrb[0].mxu0 %vm50_vm1, %v40_v14 }
  0x32   :  { %250 = vmatmul.mubr.msk.f32.vlgmr.msra.gmra.mrb[0].mxu1 %vm50_vm1, %v41_v15 }
 0x104   :  { %v120_v16 = vpop.f32.mrb[0].mxu0 }
 0x105   :  { %198 = vst.msk [vmem:[#allocation7] sm:$0xff] %vm197_vm2, %v120_v16  ;;  %v193_v17 = vpop.f32.mrb[0].mxu1  ;;  %v240_v18 = vpop.f32.mrb[1].mxu0 }
 0x106   :  { %199 = vst.msk [vmem:[#allocation7 + $0x8] sm:$0xff] %vm197_vm2, %v193_v17  ;;  %v251_v19 = vpop.f32.mrb[1].mxu1 }
 0x107   :  { %327 = shalt.err (!%p324_p6)
}
 0x108   :  { %s328_s10 = scalar_lea.hbm %s414_s2, 256 }
 0x109   :  { %p329_p7 = scmp.ne.s32.totalorder %s414_s2, %s328_s10  ;;  %p332_p8 = scmp.lt.u32.totalorder %s328_s10, %s414_s2 }
 0x10b   :  { %p334_p9 = pnand %p332_p8, %p329_p7 }
 0x10d   :  { %337 = shalt.err (!%p334_p9)
}
 0x10e   :  { %211 = dma.vmem_to_hbm [thread:$0]  %s206_s6, 256, %s414_s2, [#allocation4], %s345_s19, %s345_s19, %s346_s20  }
 0x10f   :  { %342 = dma.done.wait [#allocation4], 256  }
 0x110   :  { %343 = vsyncadd [#allocation4], 4294967040 }
 0x111   :  { %215 = vsyncpa [#allocation3], 1 }
 0x112   :  { %216 = vsyncpa [#allocation6], 1 }
 0x113   :  { %217 = vsyncpa [#allocation4], 1 }

</bundles_post_ra>
